<compile_context>
chip_gen: v6e
topology: v6e:2x2x1
jax: 0.10.0
libtpu: 0.0.40
codegen_flags: <defaults>
</compile_context>

<pallas_src>
import jax
import jax.numpy as jnp
from jax.experimental import pallas as pl
from jax.experimental.pallas import tpu as pltpu

BN_EPS = 1e-5


def _round_up(x, m):
    return (x + m - 1) // m * m


# ---------------------------------------------------------------------------
# Phase 1: Gram-matrix reduction.
#   x_ref    : (tm, Cin)   row tile of the flattened input (N*L rows, channels-last)
#   gram_ref : (Cin, Cin)  resident accumulator  G += x^T x   (per split)
#   xsum_ref : (1, Cin)    resident accumulator  per-column sum of x (per split)
# ---------------------------------------------------------------------------
def _stats_kernel(x_ref, gram_ref, xsum_ref):
    @pl.when(pl.program_id(1) == 0)          # reduction axis is the last grid axis
    def _():
        gram_ref[...] = jnp.zeros_like(gram_ref)
        xsum_ref[...] = jnp.zeros_like(xsum_ref)

    x = x_ref[...]
    gram_ref[...] += jax.lax.dot_general(     # x^T x without an explicit transpose
        x, x, dimension_numbers=(((0,), (0,)), ((), ())),
        preferred_element_type=jnp.float32)
    xsum_ref[...] += jnp.sum(x, axis=0, keepdims=True)


# ---------------------------------------------------------------------------
# Phase 2: fused conv-transpose (both taps) + BN affine + ReLU.
#   One MXU push, one FMA, one ReLU, one dense store per tile.
#   scale_ref / shift_ref are precomputed, tap-folded (1, 2*Cp) vectors.
# ---------------------------------------------------------------------------
def _conv_bn_relu_kernel(x_ref, w_ref, scale_ref, shift_ref, o_ref):
    y = jnp.dot(x_ref[...], w_ref[...], preferred_element_type=jnp.float32)
    o_ref[...] = jnp.maximum(y * scale_ref[...] + shift_ref[...], 0.0).astype(o_ref.dtype)


def upsample1d_block(x, weight, bias, gamma, beta, *, row_tile=2048, out_dtype=None):
    """x: (N, Cin, L).  weight: (Cin, Cout, 2) (PyTorch ConvTranspose1d layout).
    bias accepted for API parity but unused: training-mode BN cancels it exactly.
    Returns (N, Cout, 2L), matching the PyTorch module forward."""
    del bias  # exactly cancelled by the BatchNorm mean subtraction (training mode)

    n, cin, length = x.shape
    cout = weight.shape[1]
    nl = n * length
    out_dtype = x.dtype if out_dtype is None else out_dtype
    out_itemsize = jnp.dtype(out_dtype).itemsize

    # Adaptive channel padding: lane-dense only when it doesn't blow up the writeback.
    c_pad = _round_up(cout, 128) if cout >= 64 else cout
    two_c = 2 * c_pad

    # Row tiling (+ optional 2-way split of the stats reduction for v7x's two TCs).
    tm = _round_up(min(int(row_tile), _round_up(nl, 8)), 8)
    num_tiles = -(-nl // tm)
    nsplit = 2 if num_tiles >= 2 else 1
    tiles_per_split = -(-num_tiles // nsplit)
    total_tiles = nsplit * tiles_per_split
    nlp = total_tiles * tm

    # ---- layout glue: NCL -> (NL, Cin), zero-pad rows (zero rows add nothing to stats) ----
    x_flat = jnp.transpose(x, (0, 2, 1)).reshape(nl, cin)
    x_flat = jnp.pad(x_flat, ((0, nlp - nl), (0, 0)))

    # Fused [tap0 | tap1] weights and (optionally padded) BN parameters.
    w0 = weight[:, :, 0]
    w1 = weight[:, :, 1]
    if c_pad != cout:
        w0 = jnp.pad(w0, ((0, 0), (0, c_pad - cout)))
        w1 = jnp.pad(w1, ((0, 0), (0, c_pad - cout)))
        gamma_p = jnp.pad(gamma, (0, c_pad - cout))
        beta_p = jnp.pad(beta, (0, c_pad - cout))
    else:
        gamma_p, beta_p = gamma, beta
    w_fused = jnp.concatenate([w0, w1], axis=1)            # (Cin, 2*Cp)

    # ---- explicit scoped-VMEM budget from the double-buffered footprint --------------------
    lane = lambda v: _round_up(max(v, 1), 128)
    sub = lambda v: _round_up(max(v, 1), 8)
    x_tile_b = tm * lane(cin) * 4
    out_tile_b = tm * lane(two_c) * out_itemsize
    p1_b = 2 * x_tile_b + 2 * (sub(cin) * lane(cin) + lane(cin)) * 4
    p2_b = 2 * (x_tile_b + out_tile_b) + 2 * sub(cin) * lane(two_c) * 4 + 4 * lane(two_c) * 4
    vmem_limit = int(min(max(2 * max(p1_b, p2_b), 8 << 20), 48 << 20))

    # ---- phase 1: Gram matrix + column sums over all rows ----------------------------------
    gram_parts, xsum_parts = pl.pallas_call(
        _stats_kernel,
        grid=(nsplit, tiles_per_split),
        in_specs=[pl.BlockSpec((tm, cin), lambda c, i: (c * tiles_per_split + i, 0))],
        out_specs=(pl.BlockSpec((None, cin, cin), lambda c, i: (c, 0, 0)),
                   pl.BlockSpec((None, 1, cin), lambda c, i: (c, 0, 0))),
        out_shape=(jax.ShapeDtypeStruct((nsplit, cin, cin), jnp.float32),
                   jax.ShapeDtypeStruct((nsplit, 1, cin), jnp.float32)),
        compiler_params=pltpu.CompilerParams(
            dimension_semantics=("parallel", "arbitrary"),
            vmem_limit_bytes=vmem_limit),
        cost_estimate=pl.CostEstimate(
            flops=2 * nlp * cin * cin,
            transcendentals=0,
            bytes_accessed=(x_flat.size + nsplit * (cin * cin + cin)) * 4),
    )(x_flat)

    # ---- tiny wrapper math: derive conv-output stats and fold taps -> scale/shift ----------
    gram = jnp.sum(gram_parts, axis=0)                                  # (Cin, Cin)
    xsum = jnp.sum(xsum_parts, axis=0)                                  # (1, Cin)
    col_sum = xsum @ w_fused                                            # (1, 2*Cp)
    col_sq = jnp.sum(w_fused * (gram @ w_fused), axis=0, keepdims=True)  # (1, 2*Cp)

    count = jnp.float32(2 * nl)                       # BN elements per channel (train mode)
    s_c = col_sum[:, :c_pad] + col_sum[:, c_pad:]     # fold tap0/tap1 of the same channel
    q_c = col_sq[:, :c_pad] + col_sq[:, c_pad:]
    mean = s_c / count
    var = jnp.maximum(q_c / count - mean * mean, 0.0)  # biased variance (training BN)
    scale = gamma_p.reshape(1, c_pad) * jax.lax.rsqrt(var + BN_EPS)
    shift = beta_p.reshape(1, c_pad) - mean * scale
    scale2 = jnp.concatenate([scale, scale], axis=1).astype(jnp.float32)  # (1, 2*Cp)
    shift2 = jnp.concatenate([shift, shift], axis=1).astype(jnp.float32)

    # ---- phase 2: conv + BN affine + ReLU, fully parallel over row tiles --------------------
    y = pl.pallas_call(
        _conv_bn_relu_kernel,
        grid=(total_tiles,),
        in_specs=[pl.BlockSpec((tm, cin), lambda i: (i, 0)),
                  pl.BlockSpec((cin, two_c), lambda i: (0, 0)),   # VMEM-resident params
                  pl.BlockSpec((1, two_c), lambda i: (0, 0)),
                  pl.BlockSpec((1, two_c), lambda i: (0, 0))],
        out_specs=pl.BlockSpec((tm, two_c), lambda i: (i, 0)),
        out_shape=jax.ShapeDtypeStruct((nlp, two_c), out_dtype),
        compiler_params=pltpu.CompilerParams(
            dimension_semantics=("parallel",),
            vmem_limit_bytes=vmem_limit),
        cost_estimate=pl.CostEstimate(
            flops=2 * nlp * cin * two_c + 3 * nlp * two_c,
            transcendentals=0,
            bytes_accessed=(x_flat.size + w_fused.size + 2 * two_c) * 4
                           + nlp * two_c * out_itemsize),
    )(x_flat, w_fused, scale2, shift2)

    # ---- layout glue back to NCL (kept minimal; interleave even/odd positions) --------------
    # TODO(synk): if downstream can consume channels-last (N, 2L, Cout), return
    # y[:nl].reshape(n, 2*length, c) directly and skip this transpose pass.
    y = y[:nl]
    if c_pad != cout:
        y = jnp.concatenate([y[:, :cout], y[:, c_pad:c_pad + cout]], axis=1)
    out = y.reshape(n, length, 2, cout)                  # (N, L, tap, C)
    return jnp.transpose(out, (0, 3, 1, 2)).reshape(n, cout, 2 * length)


def reference_jax(x, weight, bias, gamma, beta):
    """Pure-JAX reference with PyTorch semantics (bias included) for a sanity check."""
    n, cin, length = x.shape
    cout = weight.shape[1]
    ye = jnp.einsum('ncl,co->nol', x, weight[:, :, 0]) + bias[None, :, None]
    yo = jnp.einsum('ncl,co->nol', x, weight[:, :, 1]) + bias[None, :, None]
    y = jnp.stack([ye, yo], axis=-1).reshape(n, cout, 2 * length)
    mean = jnp.mean(y, axis=(0, 2), keepdims=True)
    var = jnp.mean((y - mean) ** 2, axis=(0, 2), keepdims=True)
    yhat = (y - mean) / jnp.sqrt(var + BN_EPS)
    out = yhat * gamma[None, :, None] + beta[None, :, None]
    return jnp.maximum(out, 0.0)


if __name__ == "__main__":
    # Small shapes consistent with the module: batch=2, in_planes=4, out_planes=8, L=16.
    N, CIN, COUT, L = 2, 4, 8, 16

    key = jax.random.PRNGKey(0)
    kx, kw, kb, kg, kbeta = jax.random.split(key, 5)

    x = jax.random.normal(kx, (N, CIN, L), dtype=jnp.float32)
    # ConvTranspose1d weight shape: (in_planes, out_planes, kernel_size=2)
    weight = 0.2 * jax.random.normal(kw, (CIN, COUT, 2), dtype=jnp.float32)
    bias = 0.1 * jax.random.normal(kb, (COUT,), dtype=jnp.float32)
    gamma = 1.0 + 0.05 * jax.random.normal(kg, (COUT,), dtype=jnp.float32)
    beta = 0.05 * jax.random.normal(kbeta, (COUT,), dtype=jnp.float32)

    out = upsample1d_block(x, weight, bias, gamma, beta)
    out = jax.block_until_ready(out)

    ref = reference_jax(x, weight, bias, gamma, beta)
    assert out.shape == (N, COUT, 2 * L)
    assert jnp.allclose(out, ref, rtol=1e-4, atol=1e-4), "mismatch vs reference"

    print("KERNEL_OK")
</pallas_src>

<mosaic_0001>
module attributes {stable_mosaic.version = 11 : i64} {
  func.func @_stats_kernel(%arg0: i32, %arg1: i32, %arg2: memref<32x4xf32, #tpu.memory_space<vmem>>, %arg3: memref<1x4x4xf32, #tpu.memory_space<vmem>>, %arg4: memref<1x1x4xf32, #tpu.memory_space<vmem>>) attributes {dimension_semantics = [#tpu.dimension_semantics<parallel>, #tpu.dimension_semantics<arbitrary>], iteration_bounds = array<i64: 1, 1>, scalar_prefetch = 0 : i64, scratch_operands = 0 : i64, tpu.core_type = #tpu.core_type<tc>, window_params = [{transform_indices = @transform_0, window_bounds = array<i64: 32, 4>}, {transform_indices = @transform_1, window_bounds = array<i64: 1, 4, 4>}, {transform_indices = @transform_2, window_bounds = array<i64: 1, 1, 4>}]} {
    %c0_i32 = arith.constant 0 : i32
    %0 = arith.cmpi eq, %arg1, %c0_i32 : i32
    %1 = arith.extui %0 : i1 to i32
    %c0_i32_0 = arith.constant 0 : i32
    %2 = arith.cmpi ne, %1, %c0_i32_0 : i32
    scf.if %2 {
      %cst_15 = arith.constant 0.000000e+00 : f32
      %19 = vector.broadcast %cst_15 : f32 to vector<4x4xf32>
      %c0_16 = arith.constant 0 : index
      %c0_17 = arith.constant 0 : index
      %c0_18 = arith.constant 0 : index
      %20 = vector.load %arg3[%c0_16, %c0_17, %c0_18] : memref<1x4x4xf32, #tpu.memory_space<vmem>>, vector<1x4x4xf32>
      %21 = vector.shape_cast %20 : vector<1x4x4xf32> to vector<4x4xf32>
      %22 = vector.shape_cast %19 : vector<4x4xf32> to vector<1x4x4xf32>
      tpu.vector_store %arg3[%c0_16, %c0_17, %c0_18], %22 {strides = array<i32>} : memref<1x4x4xf32, #tpu.memory_space<vmem>>, vector<1x4x4xf32>,
      %cst_19 = arith.constant 0.000000e+00 : f32
      %23 = vector.broadcast %cst_19 : f32 to vector<1x4xf32>
      %c0_20 = arith.constant 0 : index
      %c0_21 = arith.constant 0 : index
      %c0_22 = arith.constant 0 : index
      %24 = vector.load %arg4[%c0_20, %c0_21, %c0_22] : memref<1x1x4xf32, #tpu.memory_space<vmem>>, vector<1x1x4xf32>
      %25 = vector.shape_cast %24 : vector<1x1x4xf32> to vector<1x4xf32>
      %26 = vector.shape_cast %23 : vector<1x4xf32> to vector<1x1x4xf32>
      tpu.vector_store %arg4[%c0_20, %c0_21, %c0_22], %26 {strides = array<i32>} : memref<1x1x4xf32, #tpu.memory_space<vmem>>, vector<1x1x4xf32>,
    } else {
    }
    %c0 = arith.constant 0 : index
    %c0_1 = arith.constant 0 : index
    %3 = vector.load %arg2[%c0, %c0_1] : memref<32x4xf32, #tpu.memory_space<vmem>>, vector<32x4xf32>
    %c0_2 = arith.constant 0 : index
    %c0_3 = arith.constant 0 : index
    %c0_4 = arith.constant 0 : index
    %4 = vector.load %arg3[%c0_2, %c0_3, %c0_4] : memref<1x4x4xf32, #tpu.memory_space<vmem>>, vector<1x4x4xf32>
    %5 = vector.shape_cast %4 : vector<1x4x4xf32> to vector<4x4xf32>
    %cst = arith.constant dense<0.000000e+00> : vector<4x4xf32>
    %6 = tpu.matmul %3, %3, %cst {dimension_numbers = #tpu.dot_dimension_numbers<[0], [0], [1], [1], [0, 1, 1, 1], [], []>} : vector<32x4xf32>, vector<32x4xf32>, vector<4x4xf32> -> vector<4x4xf32>
    %7 = arith.addf %5, %6 : vector<4x4xf32>
    %c0_5 = arith.constant 0 : index
    %c0_6 = arith.constant 0 : index
    %c0_7 = arith.constant 0 : index
    %8 = vector.load %arg3[%c0_5, %c0_6, %c0_7] : memref<1x4x4xf32, #tpu.memory_space<vmem>>, vector<1x4x4xf32>
    %9 = vector.shape_cast %8 : vector<1x4x4xf32> to vector<4x4xf32>
    %10 = vector.shape_cast %7 : vector<4x4xf32> to vector<1x4x4xf32>
    tpu.vector_store %arg3[%c0_5, %c0_6, %c0_7], %10 {strides = array<i32>} : memref<1x4x4xf32, #tpu.memory_space<vmem>>, vector<1x4x4xf32>,
    %c0_8 = arith.constant 0 : index
    %c0_9 = arith.constant 0 : index
    %c0_10 = arith.constant 0 : index
    %11 = vector.load %arg4[%c0_8, %c0_9, %c0_10] : memref<1x1x4xf32, #tpu.memory_space<vmem>>, vector<1x1x4xf32>
    %12 = vector.shape_cast %11 : vector<1x1x4xf32> to vector<1x4xf32>
    %cst_11 = arith.constant dense<0.000000e+00> : vector<4xf32>
    %13 = vector.multi_reduction <add>, %3, %cst_11 [0] : vector<32x4xf32> to vector<4xf32>
    %14 = vector.shape_cast %13 : vector<4xf32> to vector<1x4xf32>
    %15 = arith.addf %12, %14 : vector<1x4xf32>
    %c0_12 = arith.constant 0 : index
    %c0_13 = arith.constant 0 : index
    %c0_14 = arith.constant 0 : index
    %16 = vector.load %arg4[%c0_12, %c0_13, %c0_14] : memref<1x1x4xf32, #tpu.memory_space<vmem>>, vector<1x1x4xf32>
    %17 = vector.shape_cast %16 : vector<1x1x4xf32> to vector<1x4xf32>
    %18 = vector.shape_cast %15 : vector<1x4xf32> to vector<1x1x4xf32>
    tpu.vector_store %arg4[%c0_12, %c0_13, %c0_14], %18 {strides = array<i32>} : memref<1x1x4xf32, #tpu.memory_space<vmem>>, vector<1x1x4xf32>,
    return
  }
  func.func @transform_0(%arg0: i32, %arg1: i32) -> (i32, i32) {
    %c1_i32 = arith.constant 1 : i32
    %0 = arith.muli %arg0, %c1_i32 : i32
    %1 = arith.addi %0, %arg1 : i32
    %c0_i32 = arith.constant 0 : i32
    %c0_i32_0 = arith.constant 0 : i32
    return %1, %c0_i32 : i32, i32
  }
  func.func @transform_1(%arg0: i32, %arg1: i32) -> (i32, i32, i32) {
    %c0_i32 = arith.constant 0 : i32
    %c0_i32_0 = arith.constant 0 : i32
    %c0_i32_1 = arith.constant 0 : i32
    return %arg0, %c0_i32, %c0_i32_0 : i32, i32, i32
  }
  func.func @transform_2(%arg0: i32, %arg1: i32) -> (i32, i32, i32) {
    %c0_i32 = arith.constant 0 : i32
    %c0_i32_0 = arith.constant 0 : i32
    %c0_i32_1 = arith.constant 0 : i32
    return %arg0, %c0_i32, %c0_i32_0 : i32, i32, i32
  }
}

</mosaic_0001>

<bundles_post_ra>
// kernel: tpu_custom_call.1
= control target key start
LH: loop header
LB: loop body
LE: loop exit
PB: predicated region body
PF: predicated region fallthrough
CT: control target
= control target key end

     0   :  { %8 = vsyncpa [#allocation3], 0  ;;  %vm157_vm0 = vcmask 31744   ;;  %v273_v7 = vmov 0.0   ;;  %vm274_vm1 = vmmov 0   ;;  %vm38_vm2 = vcmask 27648   ;;  %s316_s0 = inlined_call_operand.vmem [shape: f32[32,4], index: 0, kind: input, shape index: {}]   ;;  %s317_s1 = inlined_call_operand.hbm [shape: f32[1,4,4], index: 1, kind: output, shape index: {0}]   ;;  %s318_s2 = inlined_call_operand.hbm [shape: f32[1,1,4], index: 2, kind: output, shape index: {1}]  }
   0x1   :  { %v42_v0 = vld [vmem:[%s316_s0] sm:$0xff]  ;;  %v43_v1 = vld [vmem:[%s316_s0 + $0x8] sm:$0xff]  ;;  %v44_v2 = vld [vmem:[%s316_s0 + $0x10] sm:$0xff]  ;;  %214 = vmatprep.subr.mxu0 %v273_v7  ;;  %222 = vmatprep.mubr.msk.f32.mxu0 %vm274_vm1, %v273_v7 }
   0x2   :  { %47 = vxpose.xlu0.b32.start [1/4] (short) (narrow) %v42_v0, 8  ;;  %v158_v3 = vsel %vm157_vm0, %v42_v0, 0.0  ;;  %v159_v4 = vsel %vm157_vm0, %v43_v1, 0.0  ;;  %v161_v5 = vsel %vm157_vm0, %v44_v2, 0.0  ;;  %v45_v6 = vld [vmem:[%s316_s0 + $0x18] sm:$0xff] }
   0x3   :  { %v160_v8 = vadd.f32 %v159_v4, %v158_v3  ;;  %215 = vmatpush3.msra.mxu0 %v45_v6 }
   0x4   :  { %9 = vsyncpa [#allocation5], 0  ;;  %v163_v9 = vsel %vm157_vm0, %v45_v6, 0.0  ;;  %216 = vmatprep.subr.mxu0 %v273_v7  ;;  %39 = vst.msk [vmem:[#allocation2] sm:$0xf] %vm38_vm2, %v273_v7  ;;  %vm79_vm3 = vcmask 261120  }
   0x5   :  { %v162_v10 = vadd.f32 %v161_v5, %v160_v8  ;;  %217 = vmatpush3.msra.mxu0 %v44_v2  ;;  %vm40_vm4 = vcmask 24576   ;;  %s275_s0 = smov [#allocation4]  }
   0x6   :  { %48 = vxpose.xlu0.b32.cont [2/4] (short) (narrow) %v43_v1, 8  ;;  %218 = vmatprep.subr.mxu0 %v273_v7  ;;  %41 = vst.msk [vmem:[#allocation4] sm:$0x1] %vm40_vm4, %v273_v7  ;;  %s190_s17 = sshll.u32 %s275_s0, 4  ;;  %s191_s17 = int_to_ptr.vmem [resolvable:$true] %s190_s17 }
   0x7   :  { %v164_v11 = vadd.f32 %v163_v9, %v162_v10  ;;  %219 = vmatpush3.msra.mxu0 %v43_v1  ;;  %s229_s18 = scalar_lea.vmem %s191_s17, 16  ;;  %s233_s19 = scalar_lea.vmem %s191_s17, 32 }
   0x8   :  { %220 = vmatprep.subr.mxu0 %v273_v7  ;;  %p230_p0 = scmp.ne.s32.totalorder %s191_s17, %s229_s18  ;;  %p234_p1 = scmp.lt.s32.totalorder %s191_s17, %s191_s17 }
   0x9   :  { %221 = vmatpush3.msra.mxu0 %v42_v0  ;;  %v165_v13 = vrot.slane %v164_v11, 4  ;;  %p235_p2 = scmp.lt.s32.totalorder %s233_s19, %s229_s18 }
   0xa   :  { %49 = vxpose.xlu0.b32.cont [3/4] (short) (narrow) %v44_v2, 8 }
   0xb   :  { %v166_v14 = vadd.f32 %v165_v13, %v164_v11  ;;  %p236_p3 = por %p235_p2, %p234_p1 }
   0xd   :  { %v167_v15 = vrot.slane %v166_v14, 2  ;;  %v156_v19 = vld [vmem:[#allocation4] sm:$0x1]  ;;  %p237_p4 = pnand %p236_p3, %p230_p0 }
   0xe   :  { %50 = vxpose.xlu0.b32.end [4/4] (short) (narrow) %v45_v6, 8 }
   0xf   :  { %v168_v16 = vadd.f32 %v167_v15, %v166_v14 }
  0x11   :  { %v169_v17 = vrot.slane %v168_v16, 1 }
  0x13   :  { %v170_v18 = vadd.f32 %v169_v17, %v168_v16 }
  0x15   :  { %v171_v20 = vadd.f32 %v170_v18, %v156_v19 }
  0x17   :  { %173 = vst.msk [vmem:[#allocation4] sm:$0x1] %vm40_vm4, %v171_v20 }
  0x7e   :  { %v63_v12 = vpop.trf.xlu0 }
  0x7f   :  { %223 = vmatmul.mubr.msk.f32.vlgmr.msra.gmra.mxu0 %vm79_vm3, %v63_v12 }
  0x80   :  { %240 = shalt.err (!%p237_p4)
}
  0x81   :  { %193 = dma.vmem_to_hbm [thread:$0]  %s191_s17, 16, %s318_s2, [#allocation5]   ;;  %v46_v21 = vld [vmem:[#allocation2] sm:$0xf] }
  0x82   :  { %s276_s22 = smov [#allocation2]  }
  0x83   :  { %s180_s23 = sshll.u32 %s276_s22, 4  ;;  %s181_s23 = int_to_ptr.vmem [resolvable:$true] %s180_s23 }
  0x84   :  { %s249_s24 = scalar_lea.vmem %s181_s23, 64  ;;  %p254_p6 = scmp.lt.s32.totalorder %s181_s23, %s181_s23 }
  0x85   :  { %p250_p5 = scmp.ne.s32.totalorder %s181_s23, %s249_s24  ;;  %p255_p7 = scmp.lt.s32.totalorder %s249_s24, %s249_s24 }
  0x87   :  { %p256_p8 = por %p255_p7, %p254_p6 }
  0x89   :  { %p257_p9 = pnand %p256_p8, %p250_p5 }
 0x13f   :  { %v149_v22 = vpop.f32.mrf.mxu0 }
 0x140   :  { %v153_v23 = vadd.f32 %v149_v22, %v46_v21 }
 0x141   :  { %v224_v24 = vpop.f32.mrf.mxu0 }
 0x142   :  { %155 = vst.msk [vmem:[#allocation2] sm:$0xf] %vm38_vm2, %v153_v23 }
 0x143   :  { %260 = shalt.err (!%p257_p9)
}
 0x144   :  { %183 = dma.vmem_to_hbm [thread:$0]  %s181_s23, 64, %s317_s1, [#allocation3]  }
 0x145   :  { %269 = dma.done.wait [#allocation3], 64  }
 0x146   :  { %270 = vsyncadd [#allocation3], 4294967232 }
 0x147   :  { %271 = dma.done.wait [#allocation5], 16  }
 0x148   :  { %272 = vsyncadd [#allocation5], 4294967280 }
 0x149   :  { %200 = vsyncpa [#allocation3], 1 }
 0x14a   :  { %201 = vsyncpa [#allocation5], 1 }

</bundles_post_ra>
